<compile_context>
chip_gen: v6e
topology: v6e:2x2x1
jax: 0.10.0
libtpu: 0.0.40
codegen_flags: <defaults>
</compile_context>

<pallas_src>
import jax
import jax.numpy as jnp
from jax import lax
from jax.experimental import pallas as pl
from jax.experimental.pallas import tpu as pltpu

ALPHA = 0.8
GAMMA = 2

_LANES = 128
_SUBLANES = 8
_MAX_BLOCK_ROWS = 4096   # (4096, 128) f32 block = 2 MiB per input
_CHUNK_ROWS = 512        # inner compute chunk (bounds vreg live ranges)
_PAD_LOGIT = -1e9        # sigmoid -> 0; with target 0 the focal term is exactly 0


def _round_up(v, m):
    return ((v + m - 1) // m) * m


def _num_tc_splits():
    """2 grid splits only on multi-TensorCore chips (v7x); 1 elsewhere."""
    try:
        kind = jax.devices()[0].device_kind.lower()
    except Exception:
        return 1
    return 2 if ("v7" in kind or "7x" in kind) else 1


def _focal_loss_kernel(x_ref, t_ref, out_ref):
    """One grid step: a (block_rows, 128) tile -> (8, 128) partial-sum accumulator."""
    i = pl.program_id(1)  # reduction axis (last)

    @pl.when(i == 0)
    def _():
        out_ref[...] = jnp.zeros_like(out_ref)

    block_rows = x_ref.shape[0]
    chunk_rows = min(_CHUNK_ROWS, block_rows)
    n_chunks = block_rows // chunk_rows  # block_rows is always a multiple (see wrapper)

    def body(c, acc):
        r = pl.multiple_of(c * chunk_rows, chunk_rows)
        x = x_ref[pl.ds(r, chunk_rows), :].astype(jnp.float32)
        t = t_ref[pl.ds(r, chunk_rows), :].astype(jnp.float32)

        # Stable softplus(x) = log(1 + e^x): one exp + one log1p.
        sp = jnp.maximum(x, 0.0) + jnp.log1p(jnp.exp(-jnp.abs(x)))
        # F.binary_cross_entropy(sigmoid(x), t, reduction='none') with the -100
        # clamp on each log term, rewritten via log(p) = x - sp, log(1-p) = -sp.
        bce = t * jnp.minimum(sp - x, 100.0) + (1.0 - t) * jnp.minimum(sp, 100.0)
        bce_exp = jnp.exp(-bce)
        # ALPHA is folded into the scalar epilogue outside the kernel.
        focal = (1.0 - bce_exp) ** GAMMA * bce

        # Fold the chunk's rows into a single (8, 128) vreg of partial sums
        # (pure VPU adds); the cross-lane reduce happens once in the wrapper.
        return acc + jnp.sum(focal.reshape(-1, _SUBLANES, _LANES), axis=0)

    partial = lax.fori_loop(0, n_chunks, body,
                            jnp.zeros((_SUBLANES, _LANES), jnp.float32),
                            unroll=True)
    out_ref[...] += partial[None, :, :]


@jax.jit
def focal_loss(inputs, targets):
    """Focal loss matching PyTorch FocalLoss.forward (mean reduction)."""
    total = inputs.size
    n_splits = _num_tc_splits()

    rows = pl.cdiv(total, _LANES)
    rows_per_split = pl.cdiv(rows, n_splits)
    if rows_per_split >= _CHUNK_ROWS:
        # Large inputs: block is a multiple of the inner chunk size.
        block_rows = min(_MAX_BLOCK_ROWS, _round_up(rows_per_split, _CHUNK_ROWS))
    else:
        # Small inputs: a single sub-chunk block (still (8,128)-aligned).
        block_rows = _round_up(rows_per_split, _SUBLANES)
    blocks_per_split = pl.cdiv(rows, n_splits * block_rows)
    padded_rows = n_splits * blocks_per_split * block_rows
    pad = padded_rows * _LANES - total

    x = inputs.reshape(-1)
    t = targets.reshape(-1)
    if pad:  # only pays the copy when the shape is not tile-aligned
        x = jnp.pad(x, (0, pad), constant_values=_PAD_LOGIT)
        t = jnp.pad(t, (0, pad), constant_values=0)
    x = x.reshape(padded_rows, _LANES)
    t = t.reshape(padded_rows, _LANES)

    partials = pl.pallas_call(
        _focal_loss_kernel,
        out_shape=jax.ShapeDtypeStruct((n_splits, _SUBLANES, _LANES),
                                       jnp.float32),
        grid=(n_splits, blocks_per_split),
        in_specs=[
            pl.BlockSpec((block_rows, _LANES),
                         lambda c, i: (c * blocks_per_split + i, 0)),
            pl.BlockSpec((block_rows, _LANES),
                         lambda c, i: (c * blocks_per_split + i, 0)),
        ],
        out_specs=pl.BlockSpec((1, _SUBLANES, _LANES), lambda c, i: (c, 0, 0)),
        compiler_params=pltpu.CompilerParams(
            dimension_semantics=("parallel", "arbitrary")),
    )(x, t)

    # ALPHA and the mean's 1/total folded into one scalar epilogue multiply.
    return jnp.sum(partials) * (ALPHA / total)


def _focal_loss_ref(inputs, targets):
    """Pure-JAX reference with the literal PyTorch formulation."""
    p = jnp.clip(jax.nn.sigmoid(inputs.reshape(-1).astype(jnp.float32)), 0.0, 1.0)
    t = targets.reshape(-1).astype(jnp.float32)
    bce = -(t * jnp.maximum(jnp.log(p), -100.0)
            + (1.0 - t) * jnp.maximum(jnp.log(1.0 - p), -100.0))
    return jnp.mean(ALPHA * (1.0 - jnp.exp(-bce)) ** GAMMA * bce)


if __name__ == "__main__":
    key = jax.random.PRNGKey(0)
    k1, k2 = jax.random.split(key)

    # Small NCHW logits + binary targets, like a segmentation head output.
    x = jax.random.normal(k1, (2, 4, 16, 16), dtype=jnp.float32)
    t = (jax.random.uniform(k2, (2, 4, 16, 16)) > 0.5).astype(jnp.float32)
    loss = focal_loss(x, t)
    jax.block_until_ready(loss)
    ref = _focal_loss_ref(x, t)
    assert jnp.allclose(loss, ref, rtol=1e-5, atol=1e-6), (loss, ref)

    # Non-tile-aligned shape exercises the tail-padding path.
    k3, k4 = jax.random.split(k1)
    x2 = jax.random.normal(k3, (2, 3, 7, 5), dtype=jnp.float32)
    t2 = (jax.random.uniform(k4, (2, 3, 7, 5)) > 0.5).astype(jnp.float32)
    loss2 = focal_loss(x2, t2)
    jax.block_until_ready(loss2)
    ref2 = _focal_loss_ref(x2, t2)
    assert jnp.allclose(loss2, ref2, rtol=1e-5, atol=1e-6), (loss2, ref2)

    # Moderately sized shape exercises the multi-chunk inner loop.
    k5, k6 = jax.random.split(k2)
    x3 = jax.random.normal(k5, (4, 8, 64, 64), dtype=jnp.float32)
    t3 = (jax.random.uniform(k6, (4, 8, 64, 64)) > 0.5).astype(jnp.float32)
    loss3 = focal_loss(x3, t3)
    jax.block_until_ready(loss3)
    ref3 = _focal_loss_ref(x3, t3)
    assert jnp.allclose(loss3, ref3, rtol=1e-5, atol=1e-6), (loss3, ref3)

    print("KERNEL_OK")
</pallas_src>

<mosaic_0001>
module attributes {stable_mosaic.version = 11 : i64} {
  func.func @_focal_loss_kernel(%arg0: i32, %arg1: i32, %arg2: memref<16x128xf32, #tpu.memory_space<vmem>>, %arg3: memref<16x128xf32, #tpu.memory_space<vmem>>, %arg4: memref<1x8x128xf32, #tpu.memory_space<vmem>>) attributes {dimension_semantics = [#tpu.dimension_semantics<parallel>, #tpu.dimension_semantics<arbitrary>], iteration_bounds = array<i64: 1, 1>, scalar_prefetch = 0 : i64, scratch_operands = 0 : i64, tpu.core_type = #tpu.core_type<tc>, window_params = [{transform_indices = @transform_0, window_bounds = array<i64: 16, 128>}, {transform_indices = @transform_1, window_bounds = array<i64: 16, 128>}, {transform_indices = @transform_2, window_bounds = array<i64: 1, 8, 128>}]} {
    %c0_i32 = arith.constant 0 : i32
    %0 = arith.cmpi eq, %arg1, %c0_i32 : i32
    %1 = arith.extui %0 : i1 to i32
    %c0_i32_0 = arith.constant 0 : i32
    %2 = arith.cmpi ne, %1, %c0_i32_0 : i32
    scf.if %2 {
      %cst_17 = arith.constant 0.000000e+00 : f32
      %42 = vector.broadcast %cst_17 : f32 to vector<1x8x128xf32>
      %c0_18 = arith.constant 0 : index
      %c0_19 = arith.constant 0 : index
      %c0_20 = arith.constant 0 : index
      %43 = vector.load %arg4[%c0_18, %c0_19, %c0_20] : memref<1x8x128xf32, #tpu.memory_space<vmem>>, vector<1x8x128xf32>
      tpu.vector_store %arg4[%c0_18, %c0_19, %c0_20], %42 {strides = array<i32>} : memref<1x8x128xf32, #tpu.memory_space<vmem>>, vector<1x8x128xf32>,
    } else {
    }
    %cst = arith.constant 0.000000e+00 : f32
    %3 = vector.broadcast %cst : f32 to vector<8x128xf32>
    %c0_i32_1 = arith.constant 0 : i32
    %c16_i32 = arith.constant 16 : i32
    %4 = arith.muli %c0_i32_1, %c16_i32 : i32
    %5 = tpu.assume_multiple %4, 16 : i32
    %6 = arith.index_cast %5 : i32 to index
    %c0 = arith.constant 0 : index
    %7 = vector.load %arg2[%6, %c0] : memref<16x128xf32, #tpu.memory_space<vmem>>, vector<16x128xf32>
    %8 = arith.index_cast %5 : i32 to index
    %c0_2 = arith.constant 0 : index
    %9 = vector.load %arg3[%8, %c0_2] : memref<16x128xf32, #tpu.memory_space<vmem>>, vector<16x128xf32>
    %cst_3 = arith.constant 0.000000e+00 : f32
    %10 = vector.broadcast %cst_3 : f32 to vector<16x128xf32>
    %11 = arith.maximumf %7, %10 : vector<16x128xf32>
    %12 = math.absf %7 : vector<16x128xf32>
    %cst_4 = arith.constant 0.000000e+00 : f32
    %13 = vector.broadcast %cst_4 : f32 to vector<16x128xf32>
    %14 = arith.subf %13, %12 : vector<16x128xf32>
    %15 = math.exp %14 : vector<16x128xf32>
    %16 = math.log1p %15 : vector<16x128xf32>
    %17 = arith.addf %11, %16 : vector<16x128xf32>
    %18 = arith.subf %17, %7 : vector<16x128xf32>
    %cst_5 = arith.constant 1.000000e+02 : f32
    %19 = vector.broadcast %cst_5 : f32 to vector<16x128xf32>
    %20 = arith.minimumf %18, %19 : vector<16x128xf32>
    %21 = arith.mulf %9, %20 : vector<16x128xf32>
    %cst_6 = arith.constant 1.000000e+00 : f32
    %22 = vector.broadcast %cst_6 : f32 to vector<16x128xf32>
    %23 = arith.subf %22, %9 : vector<16x128xf32>
    %cst_7 = arith.constant 1.000000e+02 : f32
    %24 = vector.broadcast %cst_7 : f32 to vector<16x128xf32>
    %25 = arith.minimumf %17, %24 : vector<16x128xf32>
    %26 = arith.mulf %23, %25 : vector<16x128xf32>
    %27 = arith.addf %21, %26 : vector<16x128xf32>
    %cst_8 = arith.constant 0.000000e+00 : f32
    %28 = vector.broadcast %cst_8 : f32 to vector<16x128xf32>
    %29 = arith.subf %28, %27 : vector<16x128xf32>
    %30 = math.exp %29 : vector<16x128xf32>
    %cst_9 = arith.constant 1.000000e+00 : f32
    %31 = vector.broadcast %cst_9 : f32 to vector<16x128xf32>
    %32 = arith.subf %31, %30 : vector<16x128xf32>
    %33 = arith.mulf %32, %32 : vector<16x128xf32>
    %34 = arith.mulf %33, %27 : vector<16x128xf32>
    %35 = vector.shape_cast %34 : vector<16x128xf32> to vector<2x8x128xf32>
    %cst_10 = arith.constant dense<0.000000e+00> : vector<8x128xf32>
    %36 = vector.multi_reduction <add>, %35, %cst_10 [0] : vector<2x8x128xf32> to vector<8x128xf32>
    %37 = arith.addf %3, %36 : vector<8x128xf32>
    %c1_i32 = arith.constant 1 : i32
    %c0_11 = arith.constant 0 : index
    %c0_12 = arith.constant 0 : index
    %c0_13 = arith.constant 0 : index
    %38 = vector.load %arg4[%c0_11, %c0_12, %c0_13] : memref<1x8x128xf32, #tpu.memory_space<vmem>>, vector<1x8x128xf32>
    %39 = vector.shape_cast %37 : vector<8x128xf32> to vector<1x8x128xf32>
    %40 = arith.addf %38, %39 : vector<1x8x128xf32>
    %c0_14 = arith.constant 0 : index
    %c0_15 = arith.constant 0 : index
    %c0_16 = arith.constant 0 : index
    %41 = vector.load %arg4[%c0_14, %c0_15, %c0_16] : memref<1x8x128xf32, #tpu.memory_space<vmem>>, vector<1x8x128xf32>
    tpu.vector_store %arg4[%c0_14, %c0_15, %c0_16], %40 {strides = array<i32>} : memref<1x8x128xf32, #tpu.memory_space<vmem>>, vector<1x8x128xf32>,
    return
  }
  func.func @transform_0(%arg0: i32, %arg1: i32) -> (i32, i32) {
    %c1_i32 = arith.constant 1 : i32
    %0 = arith.muli %arg0, %c1_i32 : i32
    %1 = arith.addi %0, %arg1 : i32
    %c0_i32 = arith.constant 0 : i32
    %c0_i32_0 = arith.constant 0 : i32
    return %1, %c0_i32 : i32, i32
  }
  func.func @transform_1(%arg0: i32, %arg1: i32) -> (i32, i32) {
    %c1_i32 = arith.constant 1 : i32
    %0 = arith.muli %arg0, %c1_i32 : i32
    %1 = arith.addi %0, %arg1 : i32
    %c0_i32 = arith.constant 0 : i32
    %c0_i32_0 = arith.constant 0 : i32
    return %1, %c0_i32 : i32, i32
  }
  func.func @transform_2(%arg0: i32, %arg1: i32) -> (i32, i32, i32) {
    %c0_i32 = arith.constant 0 : i32
    %c0_i32_0 = arith.constant 0 : i32
    %c0_i32_1 = arith.constant 0 : i32
    return %arg0, %c0_i32, %c0_i32_0 : i32, i32, i32
  }
}

</mosaic_0001>

<bundles_post_ra>
// kernel: focal_loss.1
= control target key start
LH: loop header
LB: loop body
LE: loop exit
PB: predicated region body
PF: predicated region fallthrough
CT: control target
= control target key end

     0   :  { %s184_s0 = inlined_call_operand.vmem [shape: f32[16,128], index: 0, kind: input, shape index: {}]   ;;  %s185_s1 = inlined_call_operand.vmem [shape: f32[16,128], index: 1, kind: input, shape index: {}]   ;;  %s186_s2 = inlined_call_operand.vmem [shape: f32[1,8,128], index: 2, kind: output, shape index: {}]  }
   0x1   :  { %v60_v0 = vld [vmem:[%s184_s0] sm:$0xff]  ;;  %v61_v1 = vld [vmem:[%s184_s0 + $0x8] sm:$0xff] }
   0x2   :  { %v66_v2 = vand.u32 2147483647, %v60_v0  ;;  %v67_v3 = vand.u32 2147483647, %v61_v1  ;;  %v64_v20 = vmax.f32 %v60_v0, 0.0  ;;  %v62_v23 = vld [vmem:[%s185_s1] sm:$0xff] }
   0x3   :  { %v65_v24 = vmax.f32 %v61_v1, 0.0  ;;  %v63_v26 = vld [vmem:[%s185_s1 + $0x8] sm:$0xff]  ;;  %v100_v31 = vsub.f32 1.0, %v62_v23 }
   0x4   :  { %v68_v4 = vsub.f32 0.0, %v66_v2  ;;  %v69_v5 = vsub.f32 0.0, %v67_v3  ;;  %v101_v33 = vsub.f32 1.0, %v63_v26 }
   0x6   :  { %v70_v6 = vmul.f32 1.442695, %v68_v4  ;;  %v72_v7 = vmul.f32 1.442695, %v69_v5 }
   0x8   :  { %142 = vpow2.f32 %v70_v6 }
   0x9   :  { %144 = vpow2.f32 %v72_v7 }
  0x15   :  { %v143_v8 = vpop.eup %142 }
  0x16   :  { %v145_v9 = vpop.eup %144  ;;  %v74_v10 = vadd.f32 1.0, %v143_v8  ;;  %v77_v12 = vmul.f32 -0.5, %v143_v8  ;;  %v80_v15 = vand.u32 2147483647, %v143_v8 }
  0x17   :  { %v83_v11 = vadd.f32 1.0, %v145_v9  ;;  %v86_v13 = vmul.f32 -0.5, %v145_v9  ;;  %v89_v17 = vand.u32 2147483647, %v145_v9 }
  0x18   :  { %146 = vlog2.f32 %v74_v10  ;;  %v78_v14 = vadd.f32 1.0, %v77_v12  ;;  %vm81_vm0 = vcmp.lt.f32.partialorder %v80_v15, 0.0004427343 }
  0x19   :  { %148 = vlog2.f32 %v83_v11  ;;  %v87_v16 = vadd.f32 1.0, %v86_v13  ;;  %vm90_vm1 = vcmp.lt.f32.partialorder %v89_v17, 0.0004427343 }
  0x1a   :  { %v79_v18 = vmul.f32 %v143_v8, %v78_v14 }
  0x1b   :  { %v88_v21 = vmul.f32 %v145_v9, %v87_v16 }
  0x25   :  { %v147_v19 = vpop.eup %146 }
  0x26   :  { %v149_v22 = vpop.eup %148  ;;  %v76_v25 = vmul.f32 0.6931472, %v147_v19 }
  0x27   :  { %v85_v27 = vmul.f32 0.6931472, %v149_v22 }
  0x28   :  { %v82_v28 = vsel %vm81_vm0, %v79_v18, %v76_v25 }
  0x29   :  { %v91_v29 = vsel %vm90_vm1, %v88_v21, %v85_v27  ;;  %v92_v30 = vadd.f32 %v82_v28, %v64_v20 }
  0x2a   :  { %v93_v32 = vadd.f32 %v91_v29, %v65_v24 }
  0x2b   :  { %v94_v34 = vsub.f32 %v92_v30, %v60_v0  ;;  %v102_v35 = vmin.f32 %v92_v30, 100.0 }
  0x2c   :  { %v95_v36 = vsub.f32 %v93_v32, %v61_v1  ;;  %v103_v37 = vmin.f32 %v93_v32, 100.0 }
  0x2d   :  { %v96_v38 = vmin.f32 %v94_v34, 100.0  ;;  %v104_v39 = vmul.f32 %v102_v35, %v100_v31 }
  0x2e   :  { %v97_v40 = vmin.f32 %v95_v36, 100.0  ;;  %v105_v41 = vmul.f32 %v103_v37, %v101_v33 }
  0x2f   :  { %v98_v42 = vmul.f32 %v96_v38, %v62_v23 }
  0x30   :  { %v99_v43 = vmul.f32 %v97_v40, %v63_v26 }
  0x31   :  { %v106_v44 = vadd.f32 %v104_v39, %v98_v42 }
  0x32   :  { %v107_v45 = vadd.f32 %v105_v41, %v99_v43 }
  0x33   :  { %v108_v46 = vsub.f32 0.0, %v106_v44 }
  0x34   :  { %v109_v47 = vsub.f32 0.0, %v107_v45 }
  0x35   :  { %v110_v48 = vmul.f32 1.442695, %v108_v46 }
  0x36   :  { %v112_v49 = vmul.f32 1.442695, %v109_v47 }
  0x37   :  { %150 = vpow2.f32 %v110_v48 }
  0x38   :  { %152 = vpow2.f32 %v112_v49 }
  0x44   :  { %v151_v50 = vpop.eup %150 }
  0x45   :  { %v153_v51 = vpop.eup %152  ;;  %v114_v52 = vsub.f32 1.0, %v151_v50 }
  0x46   :  { %v115_v53 = vsub.f32 1.0, %v153_v51 }
  0x47   :  { %v116_v54 = vmul.f32 %v114_v52, %v114_v52 }
  0x48   :  { %v117_v55 = vmul.f32 %v115_v53, %v115_v53 }
  0x49   :  { %v118_v56 = vmul.f32 %v116_v54, %v106_v44 }
  0x4a   :  { %v119_v57 = vmul.f32 %v117_v55, %v107_v45 }
  0x4c   :  { %v120_v58 = vadd.f32 %v119_v57, %v118_v56 }
  0x4e   :  { %124 = vst [vmem:[%s186_s2] sm:$0xff] %v120_v58 }

</bundles_post_ra>
